<compile_context>
chip_gen: v7x
topology: tpu7x:2x2x1
jax: 0.10.0
libtpu: 0.0.40
codegen_flags: <defaults>
</compile_context>

<pallas_src>
import functools

import jax
import jax.numpy as jnp
from jax.experimental import pallas as pl
from jax.experimental.pallas import tpu as pltpu


def _round_up(n: int, m: int) -> int:
    return ((n + m - 1) // m) * m


def qnet_kernel(x_ref, w1_ref, b1_ref, w2_ref, b2_ref, o_ref):
    # fc1 on the MXU: cast x to bf16 in-kernel (VPU, hides under MXU cadence),
    # f32 accumulation.
    h = jnp.dot(x_ref[...].astype(jnp.bfloat16), w1_ref[...],
                preferred_element_type=jnp.float32)
    # Bias add (VPU) + tanh (EUP) in f32 (v5e has no bf16 VPU/EUP).
    h = jnp.tanh(h + b1_ref[...])
    # fc2 fully in f32: tiny matmul, kernel is not FLOP-bound, keeps Q-values exact
    # enough that argmax action selection matches the f32 reference closely.
    y = jnp.dot(h, w2_ref[...], preferred_element_type=jnp.float32)
    o_ref[...] = (y + b2_ref[...]).astype(o_ref.dtype)


def prepare_params(w1, b1, w2, b2):
    """One-time (per parameter update) preprocessing, kept out of the forward path."""
    return (
        w1.astype(jnp.bfloat16),                       # fc1 weights, MXU bf16
        b1.reshape(1, -1).astype(jnp.float32),         # (1, hidden)
        w2.astype(jnp.float32),                        # fc2 weights, f32
        b2.reshape(1, -1).astype(jnp.float32),         # (1, out_dim)
    )


@functools.partial(jax.jit, static_argnames=("block_b",))
def qnetwork_forward(x, w1_bf, b1, w2, b2, *, block_b=2048):
    """x: (B, input_dim) f32.  Params from prepare_params().  Returns (B, out_dim) f32."""
    B, in_dim = x.shape
    hidden = w1_bf.shape[1]
    out_dim = w2.shape[1]

    # --- batch tile: multiple of 8 (f32 sublanes), capped so the grid keeps >=4
    #     steps when the batch allows (v7x megacore sharding needs multiple blocks).
    tm = min(block_b, _round_up(B, 8))
    tm = _round_up(tm, 8)
    quarter = _round_up(-(-B // 4), 8)
    if 8 <= quarter < tm:
        tm = quarter
    b_pad = _round_up(B, tm)
    if b_pad != B:
        x = jnp.pad(x, ((0, b_pad - B), (0, 0)))

    grid = (b_pad // tm,)

    flops = 2 * b_pad * (in_dim * hidden + hidden * out_dim)
    bytes_accessed = (b_pad * in_dim * 4          # x (f32)
                      + in_dim * hidden * 2       # W1 (bf16)
                      + hidden * 4                # b1
                      + hidden * out_dim * 4      # W2 (f32)
                      + out_dim * 4               # b2
                      + b_pad * out_dim * 4)      # out (f32, narrow)
    cost = pl.CostEstimate(flops=flops,
                           transcendentals=b_pad * hidden,
                           bytes_accessed=bytes_accessed)

    out = pl.pallas_call(
        qnet_kernel,
        out_shape=jax.ShapeDtypeStruct((b_pad, out_dim), jnp.float32),
        grid_spec=pltpu.PrefetchScalarGridSpec(
            num_scalar_prefetch=0,
            grid=grid,
            in_specs=[
                # x: one batch tile per grid step (double-buffered pipeline).
                pl.BlockSpec((tm, in_dim), lambda i: (i, 0)),
                # weights/biases: same block every step -> VMEM-resident.
                pl.BlockSpec((in_dim, hidden), lambda i: (0, 0)),
                pl.BlockSpec((1, hidden), lambda i: (0, 0)),
                pl.BlockSpec((hidden, out_dim), lambda i: (0, 0)),
                pl.BlockSpec((1, out_dim), lambda i: (0, 0)),
            ],
            # Narrow output block: last dim equals the full array dim -> legal,
            # and writes 16x fewer bytes than a 128-lane padded f32 slab.
            out_specs=pl.BlockSpec((tm, out_dim), lambda i: (i, 0)),
        ),
        compiler_params=pltpu.CompilerParams(
            dimension_semantics=("parallel",)),  # megacore sharding on v7x
        cost_estimate=cost,
    )(x, w1_bf, b1, w2, b2)

    if b_pad != B:
        out = out[:B]
    return out


def init_params(key, input_dim, output_dim, hidden_dim=128):
    """Deterministic synthetic init (uniform like torch Linear default)."""
    k1, k2, k3, k4 = jax.random.split(key, 4)
    bound1 = 1.0 / (input_dim ** 0.5)
    bound2 = 1.0 / (hidden_dim ** 0.5)
    # Stored as (in, out) so the kernel does x @ W (equivalent to torch x @ W.T).
    w1 = jax.random.uniform(k1, (input_dim, hidden_dim), jnp.float32,
                            -bound1, bound1)
    b1 = jax.random.uniform(k2, (1, hidden_dim), jnp.float32, -bound1, bound1)
    w2 = jax.random.uniform(k3, (hidden_dim, output_dim), jnp.float32,
                            -bound2, bound2)
    b2 = jax.random.uniform(k4, (1, output_dim), jnp.float32, -bound2, bound2)
    return w1, b1, w2, b2


if __name__ == "__main__":
    key = jax.random.PRNGKey(0)
    # Small demo shapes; block_b=8 forces a multi-step (grid=(3,)) pipelined run.
    batch, input_dim, hidden_dim, output_dim = 24, 32, 128, 8

    kx, kp = jax.random.split(key)
    x = jax.random.normal(kx, (batch, input_dim), jnp.float32)
    w1, b1, w2, b2 = init_params(kp, input_dim, output_dim, hidden_dim)

    # Per-parameter-set preprocessing (outside the per-step forward path).
    w1_bf, b1_k, w2_k, b2_k = prepare_params(w1, b1, w2, b2)

    out = qnetwork_forward(x, w1_bf, b1_k, w2_k, b2_k, block_b=8)
    out = jax.block_until_ready(out)

    # Sanity check vs plain-JAX f32 reference of the PyTorch forward.
    # fc1 MXU operands are bf16 (f32 accumulation), fc2 is full f32, so the
    # tolerance only covers fc1's bf16 input rounding.
    ref = jnp.tanh(x @ w1 + b1) @ w2 + b2
    assert out.shape == (batch, output_dim)
    assert jnp.allclose(out, ref, atol=2e-2, rtol=2e-2), (
        float(jnp.max(jnp.abs(out - ref))))

    print("KERNEL_OK")
</pallas_src>

<mosaic_0001>
module attributes {stable_mosaic.version = 11 : i64} {
  func.func @qnet_kernel(%arg0: i32, %arg1: memref<8x32xf32, #tpu.memory_space<vmem>>, %arg2: memref<32x128xbf16, #tpu.memory_space<vmem>>, %arg3: memref<1x128xf32, #tpu.memory_space<vmem>>, %arg4: memref<128x8xf32, #tpu.memory_space<vmem>>, %arg5: memref<1x8xf32, #tpu.memory_space<vmem>>, %arg6: memref<8x8xf32, #tpu.memory_space<vmem>>) attributes {dimension_semantics = [#tpu.dimension_semantics<parallel>], iteration_bounds = array<i64: 3>, scalar_prefetch = 0 : i64, scratch_operands = 0 : i64, tpu.core_type = #tpu.core_type<tc>, window_params = [{transform_indices = @transform_0, window_bounds = array<i64: 8, 32>}, {pipeline_mode = #tpu.pipeline_mode<synchronous>, transform_indices = @transform_1, window_bounds = array<i64: 32, 128>}, {pipeline_mode = #tpu.pipeline_mode<synchronous>, transform_indices = @transform_2, window_bounds = array<i64: 1, 128>}, {pipeline_mode = #tpu.pipeline_mode<synchronous>, transform_indices = @transform_3, window_bounds = array<i64: 128, 8>}, {pipeline_mode = #tpu.pipeline_mode<synchronous>, transform_indices = @transform_4, window_bounds = array<i64: 1, 8>}, {transform_indices = @transform_5, window_bounds = array<i64: 8, 8>}]} {
    %c0 = arith.constant 0 : index
    %c0_0 = arith.constant 0 : index
    %0 = vector.load %arg1[%c0, %c0_0] : memref<8x32xf32, #tpu.memory_space<vmem>>, vector<8x32xf32>
    %1 = arith.truncf %0 : vector<8x32xf32> to vector<8x32xbf16>
    %c0_1 = arith.constant 0 : index
    %c0_2 = arith.constant 0 : index
    %2 = vector.load %arg2[%c0_1, %c0_2] : memref<32x128xbf16, #tpu.memory_space<vmem>>, vector<32x128xbf16>
    %cst = arith.constant dense<0.000000e+00> : vector<8x128xf32>
    %3 = tpu.matmul %1, %2, %cst {dimension_numbers = #tpu.dot_dimension_numbers<[1], [0], [0], [1], [0, 0, 1, 1], [], []>} : vector<8x32xbf16>, vector<32x128xbf16>, vector<8x128xf32> -> vector<8x128xf32>
    %c0_3 = arith.constant 0 : index
    %c0_4 = arith.constant 0 : index
    %4 = vector.load %arg3[%c0_3, %c0_4] : memref<1x128xf32, #tpu.memory_space<vmem>>, vector<1x128xf32>
    %5 = vector.broadcast %4 : vector<1x128xf32> to vector<8x128xf32>
    %6 = arith.addf %3, %5 : vector<8x128xf32>
    %7 = math.tanh %6 : vector<8x128xf32>
    %c0_5 = arith.constant 0 : index
    %c0_6 = arith.constant 0 : index
    %8 = vector.load %arg4[%c0_5, %c0_6] : memref<128x8xf32, #tpu.memory_space<vmem>>, vector<128x8xf32>
    %cst_7 = arith.constant dense<0.000000e+00> : vector<8x8xf32>
    %9 = tpu.matmul %7, %8, %cst_7 {dimension_numbers = #tpu.dot_dimension_numbers<[1], [0], [0], [1], [0, 0, 1, 1], [], []>} : vector<8x128xf32>, vector<128x8xf32>, vector<8x8xf32> -> vector<8x8xf32>
    %c0_8 = arith.constant 0 : index
    %c0_9 = arith.constant 0 : index
    %10 = vector.load %arg5[%c0_8, %c0_9] : memref<1x8xf32, #tpu.memory_space<vmem>>, vector<1x8xf32>
    %11 = vector.broadcast %10 : vector<1x8xf32> to vector<8x8xf32>
    %12 = arith.addf %9, %11 : vector<8x8xf32>
    %c0_10 = arith.constant 0 : index
    %c0_11 = arith.constant 0 : index
    %13 = vector.load %arg6[%c0_10, %c0_11] : memref<8x8xf32, #tpu.memory_space<vmem>>, vector<8x8xf32>
    tpu.vector_store %arg6[%c0_10, %c0_11], %12 {strides = array<i32>} : memref<8x8xf32, #tpu.memory_space<vmem>>, vector<8x8xf32>,
    return
  }
  func.func @transform_0(%arg0: i32) -> (i32, i32) {
    %c0_i32 = arith.constant 0 : i32
    %c0_i32_0 = arith.constant 0 : i32
    return %arg0, %c0_i32 : i32, i32
  }
  func.func @transform_1(%arg0: i32) -> (i32, i32) {
    %c0_i32 = arith.constant 0 : i32
    %c0_i32_0 = arith.constant 0 : i32
    %c0_i32_1 = arith.constant 0 : i32
    return %c0_i32, %c0_i32_0 : i32, i32
  }
  func.func @transform_2(%arg0: i32) -> (i32, i32) {
    %c0_i32 = arith.constant 0 : i32
    %c0_i32_0 = arith.constant 0 : i32
    %c0_i32_1 = arith.constant 0 : i32
    return %c0_i32, %c0_i32_0 : i32, i32
  }
  func.func @transform_3(%arg0: i32) -> (i32, i32) {
    %c0_i32 = arith.constant 0 : i32
    %c0_i32_0 = arith.constant 0 : i32
    %c0_i32_1 = arith.constant 0 : i32
    return %c0_i32, %c0_i32_0 : i32, i32
  }
  func.func @transform_4(%arg0: i32) -> (i32, i32) {
    %c0_i32 = arith.constant 0 : i32
    %c0_i32_0 = arith.constant 0 : i32
    %c0_i32_1 = arith.constant 0 : i32
    return %c0_i32, %c0_i32_0 : i32, i32
  }
  func.func @transform_5(%arg0: i32) -> (i32, i32) {
    %c0_i32 = arith.constant 0 : i32
    %c0_i32_0 = arith.constant 0 : i32
    return %arg0, %c0_i32 : i32, i32
  }
}

</mosaic_0001>

<bundles_post_ra>
// kernel: qnetwork_forward.1
= control target key start
LH: loop header
LB: loop body
LE: loop exit
PB: predicated region body
PF: predicated region fallthrough
CT: control target
= control target key end

     0   :  { %s596_s18 = smov 0   ;;  %s680_s0 = inlined_call_operand.vmem [shape: f32[24,32], index: 0, kind: input, shape index: {}]   ;;  %s681_s1 = inlined_call_operand.vmem [shape: bf16[32,128], index: 1, kind: input, shape index: {}]   ;;  %s682_s2 = inlined_call_operand.vmem [shape: f32[1,128], index: 2, kind: input, shape index: {}]   ;;  %s683_s3 = inlined_call_operand.vmem [shape: f32[128,8], index: 3, kind: input, shape index: {}]   ;;  %s684_s4 = inlined_call_operand.vmem [shape: f32[1,8], index: 4, kind: input, shape index: {}]   ;;  %s685_s5 = inlined_call_operand.vmem [shape: f32[24,8], index: 5, kind: output, shape index: {}]  }
   0x1 LB: > { %s439_s19 = sadd.s32 4294967295, %s561_s18   ;;  %p443_p0 = scmp.ge.s32.totalorder %s561_s18, 1  ;;  %s561_s18 = sphi %s596_s18, %s15_s18  }
   0x2   : > { %p186_p1 = scmp.lt.s32.totalorder %s561_s18, 4 }
   0x4   : > { %p187_p2 = pnand %p443_p0, %p186_p1 }
   0x5   : > { %v551_v0 = vld [vmem:[%s681_s1] sm:$0xff] (!%p187_p2)   ;;  %v563_v1 = vmov (!%p187_p2), 0.0   ;;  %v552_v2 = vld [vmem:[%s681_s1 + $0x8] sm:$0xff] (!%p187_p2)   ;;  %vm564_vm0 = vmmov (!%p187_p2), 0   ;;  %p212_p3 = scmp.lt.s32.totalorder (!%p187_p2), %s439_s19, 2  ;;  %v293_v5 = vld [vmem:[%s683_s3 + $0x10] sm:$0xff] (!%p187_p2) }
   0x6   : > { %190 = sbr.rel (%p187_p2) target bundleno = 459 (0x1cb), region = 40  ;;  %473 = vmatprep.subr.bf16.mxu0 (!%p187_p2), %v563_v1  ;;  %477 = vmatprep.mubr.msk.bf16.mxu0 (!%p187_p2), %vm564_vm0, %v563_v1  ;;  %v291_v3 = vld [vmem:[%s683_s3] sm:$0xff] (!%p187_p2)  ;;  %v292_v4 = vld [vmem:[%s683_s3 + $0x8] sm:$0xff] (!%p187_p2)  ;;  %v565_v6 = vmov (!%p187_p2), 0.0|0.0   ;;  %v294_v8 = vld [vmem:[%s683_s3 + $0x18] sm:$0xff] (!%p187_p2)  ;;  %vm246_vm1 = vcmask (!%p187_p2), 261120  }
   0x7   : > { %474 = vmatpush3.bf16.msra.mxu0 (!%p187_p2), %v551_v0  ;;  %516 = vmatprep.subr.bf16.mxu1 (!%p187_p2), %v565_v6  ;;  %v517_v7 = vpack.c.bf16 (!%p187_p2), %v292_v4, %v291_v3  ;;  %v520_v9 = vpack.c.bf16 (!%p187_p2), %v294_v8, %v293_v5  ;;  %v295_v10 = vld [vmem:[%s683_s3 + $0x20] sm:$0xff] (!%p187_p2)  ;;  %v296_v11 = vld [vmem:[%s683_s3 + $0x28] sm:$0xff] (!%p187_p2)  ;;  %v297_v15 = vld [vmem:[%s683_s3 + $0x30] sm:$0xff] (!%p187_p2)  ;;  %vm384_vm2 = vcmask (!%p187_p2), 64512  }
   0x8   : > { %475 = vmatprep.subr.bf16.mxu0 (!%p187_p2), %v563_v1  ;;  %513 = vmatprep.mubr.msk.f32.mxu1 (!%p187_p2), %vm564_vm0, %v563_v1  ;;  %v523_v14 = vpack.c.bf16 (!%p187_p2), %v296_v11, %v295_v10  ;;  %v298_v16 = vld [vmem:[%s683_s3 + $0x38] sm:$0xff] (!%p187_p2)  ;;  %v299_v18 = vld [vmem:[%s683_s3 + $0x40] sm:$0xff] (!%p187_p2)  ;;  %v300_v19 = vld [vmem:[%s683_s3 + $0x48] sm:$0xff] (!%p187_p2) }
   0x9   : > { %518 = vmatpush3.bf16.msra.mxu1 (!%p187_p2), %v517_v7  ;;  %v526_v17 = vpack.c.bf16 (!%p187_p2), %v298_v16, %v297_v15  ;;  %v529_v20 = vpack.c.bf16 (!%p187_p2), %v300_v19, %v299_v18  ;;  %v301_v21 = vld [vmem:[%s683_s3 + $0x50] sm:$0xff] (!%p187_p2)  ;;  %v302_v22 = vld [vmem:[%s683_s3 + $0x58] sm:$0xff] (!%p187_p2)  ;;  %v303_v24 = vld [vmem:[%s683_s3 + $0x60] sm:$0xff] (!%p187_p2) }
   0xa   : > { %519 = vmatprep.subr.bf16.mxu1 (!%p187_p2), %v565_v6  ;;  %v532_v23 = vpack.c.bf16 (!%p187_p2), %v302_v22, %v301_v21  ;;  %v304_v25 = vld [vmem:[%s683_s3 + $0x68] sm:$0xff] (!%p187_p2)  ;;  %v305_v27 = vld [vmem:[%s683_s3 + $0x70] sm:$0xff] (!%p187_p2)  ;;  %v306_v28 = vld [vmem:[%s683_s3 + $0x78] sm:$0xff] (!%p187_p2) }
   0xb   : > { %476 = vmatpush3.bf16.msra.mxu0 (!%p187_p2), %v552_v2  ;;  %v535_v26 = vpack.c.bf16 (!%p187_p2), %v304_v25, %v303_v24  ;;  %v538_v29 = vpack.c.bf16 (!%p187_p2), %v306_v28, %v305_v27  ;;  %v446_v30 = vld [vmem:[%s682_s2] ss:$0 sm:$0xff] (!%p187_p2) }
   0xc   : > { %v450_v37 = vld [vmem:[%s684_s4] ss:$0 sm:$0xff] (!%p187_p2) }
   0xd   : > { %s687_s19 = smov (!%p212_p3, %s439_s19), 2  ;;  %521 = vmatpush3.bf16.msra.mxu1 %v520_v9 }
   0xe   : > { %s444_s7 = sshll.u32 %s687_s19, 3  ;;  %522 = vmatprep.subr.bf16.mxu1 %v565_v6 }
   0xf   : > { %s215_s14 = scalar_lea.vmem %s680_s0, %s444_s7  ;;  %s219_s21 = scalar_lea.vmem %s685_s5, %s444_s7 }
  0x10   : > { %v221_v12 = vld [vmem:[%s215_s14] sm:$0xff] }
  0x11   : > { %v222_v13 = vpack.c.bf16 %v221_v12, %v221_v12  ;;  %524 = vmatpush3.bf16.msra.mxu1 %v523_v14 }
  0x12   : > { %525 = vmatprep.subr.bf16.mxu1 %v565_v6 }
  0x13   : > { %478 = vmatmul.mubr.msk.bf16.vlgmr.msra.gmra.mrb[0].mxu0 %vm246_vm1, %v222_v13 }
  0x15   : > { %527 = vmatpush3.bf16.msra.mxu1 %v526_v17 }
  0x16   : > { %528 = vmatprep.subr.bf16.mxu1 %v565_v6 }
  0x19   : > { %530 = vmatpush3.bf16.msra.mxu1 %v529_v20 }
  0x1a   : > { %531 = vmatprep.subr.bf16.mxu1 %v565_v6 }
  0x1d   : > { %533 = vmatpush3.bf16.msra.mxu1 %v532_v23 }
  0x1e   : > { %534 = vmatprep.subr.bf16.mxu1 %v565_v6 }
  0x21   : > { %536 = vmatpush3.bf16.msra.mxu1 %v535_v26 }
  0x22   : > { %537 = vmatprep.subr.bf16.mxu1 %v565_v6 }
  0x25   : > { %539 = vmatpush3.bf16.msra.mxu1 %v538_v29 }
  0xe6   : > { %v284_v31 = vpop.f32.mrb[0].mxu0 }
  0xe7   : > { %v285_v32 = vadd.f32 %v446_v30, %v284_v31  ;;  %v479_v33 = vpop.f32.mrb[1].mxu0 }
  0xe8   : > { %v287_v34 = vpop.f32.mrb[2].mxu0 }
  0xe9   : > { %553 = vtanh.f32 %v285_v32  ;;  %v480_v35 = vpop.f32.mrb[3].mxu0 }
  0xf3   : > { %v554_v36 = vpop.eup %553 }
  0xf4   : > { %514 = vmatmul.mubr.f32.vlgmr.msra.gmra.mrb[0].mxu1 %v554_v36 }
 0x1c7   : > { %v380_v38 = vpop.f32.mrb[0].mxu1 }
 0x1c8   : > { %v381_v39 = vadd.f32 %v450_v37, %v380_v38  ;;  %v515_v40 = vpop.f32.mrb[1].mxu1 }
 0x1ca   : > { %385 = vst.msk [vmem:[%s219_s21] sm:$0xff] %vm384_vm2, %v381_v39 }
 0x1cb PF: > { %s15_s18 = sadd.s32 1, %s561_s18  }
 0x1cc   : > { %p12_p4 = scmp.ge.s32.totalorder %s15_s18, 5  }
 0x1ce   :  { %14 = sbr.rel (!%p12_p4) target bundleno = 1 (0x1), region = 70 }

</bundles_post_ra>
